<compile_context>
chip_gen: v7x
topology: tpu7x:2x2x1
jax: 0.10.0
libtpu: 0.0.40
codegen_flags: <defaults>
</compile_context>

<pallas_src>
import functools
import math

import jax
import jax.numpy as jnp
from jax import lax
from jax.experimental import pallas as pl
from jax.experimental.pallas import tpu as pltpu


def _layernorm_kernel(x_ref, gamma_ref, beta_ref, o_ref, *, eps, inv_h):
    # x_ref: (TR, H) tile; gamma_ref / beta_ref: (1, H).
    # One-pass mean/variance in f32: var = E[x^2] - mu^2.
    x = x_ref[...].astype(jnp.float32)
    mu = jnp.sum(x, axis=-1, keepdims=True) * inv_h
    ex2 = jnp.sum(x * x, axis=-1, keepdims=True) * inv_h
    var = jnp.maximum(ex2 - mu * mu, 0.0)      # guard cancellation / ragged-row garbage
    inv = lax.rsqrt(var + eps)                 # eps inside sqrt (TF-style)
    y = (x - mu) * inv
    g = gamma_ref[...].astype(jnp.float32)
    b = beta_ref[...].astype(jnp.float32)
    o_ref[...] = (g * y + b).astype(o_ref.dtype)


def bert_layer_norm(x, gamma, beta, eps=1e-12):
    """x: (..., hidden). gamma/beta: (hidden,). Returns same shape/dtype as x."""
    orig_shape = x.shape
    h = int(orig_shape[-1])
    rows = int(math.prod(orig_shape[:-1])) if len(orig_shape) > 1 else 1

    # Tiny hidden (< 128 lanes): the tiled layout wastes ~4x bandwidth on masked
    # lanes/stores; let XLA handle (and fuse) it instead.
    # TODO(synk): pack k=128//h rows into the lane axis with segmented reductions
    # if a Pallas path for tiny hidden ever matters.
    if h < 128:
        xf = x.astype(jnp.float32)
        u = jnp.mean(xf, axis=-1, keepdims=True)
        s = jnp.mean((xf - u) ** 2, axis=-1, keepdims=True)
        y = gamma.astype(jnp.float32) * ((xf - u) * lax.rsqrt(s + eps)) + beta.astype(jnp.float32)
        return y.astype(x.dtype)

    x2 = x.reshape(rows, h)
    g2 = gamma.reshape(1, h)
    b2 = beta.reshape(1, h)
    itemsize = jnp.dtype(x.dtype).itemsize
    param_itemsize = jnp.dtype(gamma.dtype).itemsize

    # --- generation-aware VMEM ceiling ---
    try:
        vmem_cap = int(pltpu.get_tpu_info().vmem_capacity_bytes)
    except Exception:
        vmem_cap = 64 * 1024 * 1024            # assume the smallest (v7x, 64 MiB/TC)
    vmem_ceiling = min(vmem_cap - 16 * 1024 * 1024, 48 * 1024 * 1024)
    vmem_ceiling = max(vmem_ceiling, 16 * 1024 * 1024)

    # --- row tile: largest aligned tile under budget, capped at 1024 rows ---
    row_align = 16 if itemsize == 2 else (32 if itemsize == 1 else 8)
    # Per-row VMEM cost: in+out tiles double-buffered, plus ~3 f32 temporaries
    # (x, y, store staging) from in-kernel upcasting.
    per_row_bytes = 4 * h * itemsize + 3 * h * 4
    tile_budget = min(24 * 1024 * 1024, vmem_ceiling // 2)
    tr_cap = (tile_budget // per_row_bytes) // row_align * row_align
    tr_cap = max(row_align, min(tr_cap, 1024))   # 2048 buys ~nothing vs 1024 (roofline ~86%)

    if rows <= row_align:
        tr = rows                                # block equals full row extent (legal)
    else:
        tr = min(tr_cap, (rows // row_align) * row_align)
        # v7x megacore: ensure the "parallel" axis has >=2 grid steps when the whole
        # input would otherwise fit one tile (zero cost on v5e/v6e: grid is a loop).
        if pl.cdiv(rows, tr) < 2 and tr >= 1024:
            tr = ((tr // 2) + row_align - 1) // row_align * row_align
    grid = (pl.cdiv(rows, tr),)

    # Scoped VMEM: pipelined tile buffers + single-buffered gamma/beta, with headroom.
    work_set = 4 * tr * h * itemsize + 2 * h * param_itemsize
    vmem_limit = int(min(vmem_ceiling, max(16 * 1024 * 1024, 2 * work_set)))

    # Advisory cost: actual traffic (read + write of x, plus gamma/beta once).
    io_bytes = 2 * rows * h * itemsize + 2 * h * param_itemsize
    cost = pl.CostEstimate(
        flops=7 * rows * h,
        transcendentals=rows,
        bytes_accessed=io_bytes,
    )

    kernel = functools.partial(_layernorm_kernel, eps=float(eps), inv_h=1.0 / float(h))

    out = pl.pallas_call(
        kernel,
        out_shape=jax.ShapeDtypeStruct((rows, h), x.dtype),
        grid_spec=pltpu.PrefetchScalarGridSpec(
            num_scalar_prefetch=0,
            grid=grid,
            in_specs=[
                pl.BlockSpec((tr, h), lambda i: (i, 0)),
                # Constant index map -> single DMA; Buffered(1) avoids reserving a
                # second (never used) VMEM buffer for gamma/beta.
                pl.BlockSpec((1, h), lambda i: (0, 0), pipeline_mode=pl.Buffered(1)),
                pl.BlockSpec((1, h), lambda i: (0, 0), pipeline_mode=pl.Buffered(1)),
            ],
            out_specs=pl.BlockSpec((tr, h), lambda i: (i, 0)),
        ),
        compiler_params=pltpu.CompilerParams(
            dimension_semantics=("parallel",),
            vmem_limit_bytes=vmem_limit,
        ),
        cost_estimate=cost,
    )(x2, g2, b2)

    return out.reshape(orig_shape)


if __name__ == "__main__":
    key = jax.random.PRNGKey(0)
    k1, k2, k3, k4, k5 = jax.random.split(key, 5)

    def ref_ln(x, g, b, eps=1e-12):
        u = jnp.mean(x, axis=-1, keepdims=True)
        s = jnp.mean((x - u) ** 2, axis=-1, keepdims=True)
        return g * ((x - u) / jnp.sqrt(s + eps)) + b

    # Case 1: DETR decoder hidden (decoder_embed_dim ~ 256), init_bert_weights
    # style params (gamma=1, beta=0). rows=16 -> single tile, lane-dense stores.
    batch, seq, hidden = 2, 8, 256
    x1 = jax.random.normal(k1, (batch, seq, hidden), dtype=jnp.float32)
    g1 = jnp.ones((hidden,), dtype=jnp.float32)
    b1 = jnp.zeros((hidden,), dtype=jnp.float32)
    y1 = bert_layer_norm(x1, g1, b1, eps=1e-12)
    jax.block_until_ready(y1)
    assert y1.shape == x1.shape and y1.dtype == x1.dtype
    assert jnp.allclose(y1, ref_ln(x1, g1, b1), atol=1e-4, rtol=1e-4), "mismatch (case 1)"

    # Case 2: ragged rows (21) + hidden not a multiple of 128 (200) + non-trivial
    # affine -> exercises the ragged final block and full-width last-dim block.
    x2 = jax.random.normal(k2, (3, 7, 200), dtype=jnp.float32)
    g2 = 1.0 + 0.1 * jax.random.normal(k3, (200,), dtype=jnp.float32)
    b2 = 0.1 * jax.random.normal(k4, (200,), dtype=jnp.float32)
    y2 = bert_layer_norm(x2, g2, b2, eps=1e-12)
    jax.block_until_ready(y2)
    assert jnp.allclose(y2, ref_ln(x2, g2, b2), atol=1e-4, rtol=1e-4), "mismatch (case 2)"

    # Case 3: tiny hidden (h=32) -> XLA fallback path.
    x3 = jax.random.normal(k5, (2, 8, 32), dtype=jnp.float32)
    g3 = jnp.ones((32,), dtype=jnp.float32)
    b3 = jnp.zeros((32,), dtype=jnp.float32)
    y3 = bert_layer_norm(x3, g3, b3, eps=1e-12)
    jax.block_until_ready(y3)
    assert jnp.allclose(y3, ref_ln(x3, g3, b3), atol=1e-4, rtol=1e-4), "mismatch (case 3)"

    print("KERNEL_OK")
</pallas_src>

<mosaic_0001>
module attributes {stable_mosaic.version = 11 : i64} {
  func.func @_layernorm_kernel(%arg0: i32, %arg1: memref<16x256xf32, #tpu.memory_space<vmem>>, %arg2: memref<1x256xf32, #tpu.memory_space<vmem>>, %arg3: memref<1x256xf32, #tpu.memory_space<vmem>>, %arg4: memref<16x256xf32, #tpu.memory_space<vmem>>) attributes {dimension_semantics = [#tpu.dimension_semantics<parallel>], iteration_bounds = array<i64: 1>, scalar_prefetch = 0 : i64, scratch_operands = 0 : i64, tpu.core_type = #tpu.core_type<tc>, window_params = [{transform_indices = @transform_0, window_bounds = array<i64: 16, 256>}, {pipeline_mode = #tpu.pipeline_mode<synchronous>, transform_indices = @transform_1, window_bounds = array<i64: 1, 256>}, {pipeline_mode = #tpu.pipeline_mode<synchronous>, transform_indices = @transform_2, window_bounds = array<i64: 1, 256>}, {transform_indices = @transform_3, window_bounds = array<i64: 16, 256>}]} {
    %c0 = arith.constant 0 : index
    %c0_0 = arith.constant 0 : index
    %0 = vector.load %arg1[%c0, %c0_0] : memref<16x256xf32, #tpu.memory_space<vmem>>, vector<16x256xf32>
    %cst = arith.constant dense<0.000000e+00> : vector<16xf32>
    %1 = vector.multi_reduction <add>, %0, %cst [1] : vector<16x256xf32> to vector<16xf32>
    %2 = vector.shape_cast %1 : vector<16xf32> to vector<16x1xf32>
    %cst_1 = arith.constant 3.906250e-03 : f32
    %3 = vector.broadcast %cst_1 : f32 to vector<16x1xf32>
    %4 = arith.mulf %2, %3 : vector<16x1xf32>
    %5 = arith.mulf %0, %0 : vector<16x256xf32>
    %cst_2 = arith.constant dense<0.000000e+00> : vector<16xf32>
    %6 = vector.multi_reduction <add>, %5, %cst_2 [1] : vector<16x256xf32> to vector<16xf32>
    %7 = vector.shape_cast %6 : vector<16xf32> to vector<16x1xf32>
    %cst_3 = arith.constant 3.906250e-03 : f32
    %8 = vector.broadcast %cst_3 : f32 to vector<16x1xf32>
    %9 = arith.mulf %7, %8 : vector<16x1xf32>
    %10 = arith.mulf %4, %4 : vector<16x1xf32>
    %11 = arith.subf %9, %10 : vector<16x1xf32>
    %cst_4 = arith.constant 0.000000e+00 : f32
    %12 = vector.broadcast %cst_4 : f32 to vector<16x1xf32>
    %13 = arith.maximumf %11, %12 : vector<16x1xf32>
    %cst_5 = arith.constant 9.99999996E-13 : f32
    %14 = vector.broadcast %cst_5 : f32 to vector<16x1xf32>
    %15 = arith.addf %13, %14 : vector<16x1xf32>
    %16 = math.rsqrt %15 : vector<16x1xf32>
    %17 = vector.broadcast %4 : vector<16x1xf32> to vector<16x256xf32>
    %18 = arith.subf %0, %17 : vector<16x256xf32>
    %19 = vector.broadcast %16 : vector<16x1xf32> to vector<16x256xf32>
    %20 = arith.mulf %18, %19 : vector<16x256xf32>
    %c0_6 = arith.constant 0 : index
    %c0_7 = arith.constant 0 : index
    %21 = vector.load %arg2[%c0_6, %c0_7] : memref<1x256xf32, #tpu.memory_space<vmem>>, vector<1x256xf32>
    %c0_8 = arith.constant 0 : index
    %c0_9 = arith.constant 0 : index
    %22 = vector.load %arg3[%c0_8, %c0_9] : memref<1x256xf32, #tpu.memory_space<vmem>>, vector<1x256xf32>
    %23 = vector.broadcast %21 : vector<1x256xf32> to vector<16x256xf32>
    %24 = arith.mulf %23, %20 : vector<16x256xf32>
    %25 = vector.broadcast %22 : vector<1x256xf32> to vector<16x256xf32>
    %26 = arith.addf %24, %25 : vector<16x256xf32>
    %c0_10 = arith.constant 0 : index
    %c0_11 = arith.constant 0 : index
    %27 = vector.load %arg4[%c0_10, %c0_11] : memref<16x256xf32, #tpu.memory_space<vmem>>, vector<16x256xf32>
    tpu.vector_store %arg4[%c0_10, %c0_11], %26 {strides = array<i32>} : memref<16x256xf32, #tpu.memory_space<vmem>>, vector<16x256xf32>,
    return
  }
  func.func @transform_0(%arg0: i32) -> (i32, i32) {
    %c0_i32 = arith.constant 0 : i32
    %c0_i32_0 = arith.constant 0 : i32
    return %arg0, %c0_i32 : i32, i32
  }
  func.func @transform_1(%arg0: i32) -> (i32, i32) {
    %c0_i32 = arith.constant 0 : i32
    %c0_i32_0 = arith.constant 0 : i32
    %c0_i32_1 = arith.constant 0 : i32
    return %c0_i32, %c0_i32_0 : i32, i32
  }
  func.func @transform_2(%arg0: i32) -> (i32, i32) {
    %c0_i32 = arith.constant 0 : i32
    %c0_i32_0 = arith.constant 0 : i32
    %c0_i32_1 = arith.constant 0 : i32
    return %c0_i32, %c0_i32_0 : i32, i32
  }
  func.func @transform_3(%arg0: i32) -> (i32, i32) {
    %c0_i32 = arith.constant 0 : i32
    %c0_i32_0 = arith.constant 0 : i32
    return %arg0, %c0_i32 : i32, i32
  }
}

</mosaic_0001>

<bundles_post_ra>
// kernel: tpu_custom_call.1
= control target key start
LH: loop header
LB: loop body
LE: loop exit
PB: predicated region body
PF: predicated region fallthrough
CT: control target
= control target key end

     0   :  { %8 = vsyncpa [#allocation3], 0  ;;  %s240_s0 = inlined_call_operand.hbm [shape: f32[16,256], index: 0, kind: input, shape index: {}]   ;;  %s241_s1 = inlined_call_operand.vmem [shape: f32[1,256], index: 1, kind: input, shape index: {}]   ;;  %s242_s2 = inlined_call_operand.vmem [shape: f32[1,256], index: 2, kind: input, shape index: {}]   ;;  %s243_s3 = inlined_call_operand.hbm [shape: f32[16,256], index: 3, kind: output, shape index: {}]  }
   0x1   :  { %9 = vsyncpa [#allocation4], 0  ;;  %s180_s12 = smov [#allocation2]   ;;  %s132_s16 = scalar_lea.hbm %s240_s0, 512 }
   0x2   :  { %s15_s13 = sshll.u32 %s180_s12, 4  ;;  %p133_p0 = scmp.ne.s32.totalorder %s240_s0, %s132_s16  ;;  %s16_s13 = int_to_ptr.vmem [resolvable:$true] %s15_s13 }
   0x3   :  { %p136_p1 = scmp.lt.u32.totalorder %s132_s16, %s240_s0 }
   0x5   :  { %p138_p2 = pnand %p136_p1, %p133_p0 }
   0x7   :  { %141 = shalt.err (!%p138_p2)
}
   0x8   :  { %s142_s21 = scalar_lea.vmem %s16_s13, 512  ;;  %p147_p4 = scmp.lt.s32.totalorder %s16_s13, %s16_s13 }
   0x9   :  { %p143_p3 = scmp.ne.s32.totalorder %s16_s13, %s142_s21  ;;  %p148_p5 = scmp.lt.s32.totalorder %s142_s21, %s142_s21 }
   0xb   :  { %p149_p6 = por %p148_p5, %p147_p4 }
   0xd   :  { %p150_p7 = pnand %p149_p6, %p143_p3 }
   0xf   :  { %153 = shalt.err (!%p150_p7)
}
  0x10   :  { %s181_s22 = smov 256   ;;  %s182_s23 = smov 16  }
  0x11   :  { %21 = dma.hbm_to_vmem [thread:$0]  %s240_s0, 512, %s16_s13, [#allocation3], %s181_s22, %s181_s22, %s182_s23  }
  0x12   :  { %176 = dma.done.wait [#allocation3], 512  }
  0x13   :  { %177 = vsyncadd [#allocation3], 4294966784  ;;  %v29_v0 = vld [vmem:[#allocation2] sm:$0xff]  ;;  %v30_v1 = vld [vmem:[#allocation2 + $0x8] sm:$0xff]  ;;  %v74_v24 = vlaneseq }
  0x14   :  { %v31_v2 = vld [vmem:[#allocation2 + $0x10] sm:$0xff]  ;;  %v33_v3 = vadd.f32 %v30_v1, %v29_v0  ;;  %v41_v4 = vmul.f32 %v29_v0, %v29_v0  ;;  %v42_v5 = vmul.f32 %v30_v1, %v30_v1  ;;  %v32_v6 = vld [vmem:[#allocation2 + $0x18] sm:$0xff]  ;;  %v71_v32 = vld [vmem:[%s241_s1] sm:$0x3]  ;;  %s183_s1 = smov [#allocation5]  }
  0x15   :  { %v43_v7 = vmul.f32 %v31_v2, %v31_v2  ;;  %v44_v8 = vmul.f32 %v32_v6, %v32_v6  ;;  %v36_v10 = vadd.f32 %v32_v6, %v31_v2  ;;  %v75_v28 = vshrl.u32 %v74_v24, 7  ;;  %v72_v33 = vld [vmem:[%s242_s2] sm:$0x3]  ;;  %s112_s2 = sshll.u32 %s183_s1, 4  ;;  %s113_s2 = int_to_ptr.vmem [resolvable:$true] %s112_s2 }
  0x16   :  { %34 = vadd.xlane.f32.xlu0 %v33_v3  ;;  %v45_v9 = vadd.f32 %v42_v5, %v41_v4  ;;  %s154_s29 = scalar_lea.vmem %s113_s2, 512  ;;  %p159_p9 = scmp.lt.s32.totalorder %s113_s2, %s113_s2 }
  0x17   :  { %v48_v11 = vadd.f32 %v44_v8, %v43_v7  ;;  %v76_v30 = vsub.s32 0, %v75_v28  ;;  %v80_v31 = vsub.s32 1, %v75_v28  ;;  %p155_p8 = scmp.ne.s32.totalorder %s113_s2, %s154_s29  ;;  %p160_p10 = scmp.lt.s32.totalorder %s154_s29, %s154_s29 }
  0x18   :  { %46 = vadd.xlane.f32.xlu1 %v45_v9 }
  0x19   :  { %v77_v36 = vrot.slane %v71_v32, %v76_v30  ;;  %v81_v37 = vrot.slane %v71_v32, %v80_v31  ;;  %v92_v41 = vrot.slane %v72_v33, %v76_v30  ;;  %v96_v42 = vrot.slane %v72_v33, %v80_v31  ;;  %p161_p11 = por %p160_p10, %p159_p9 }
  0x1a   :  { %37 = vadd.xlane.f32.xlu0 %v36_v10 }
  0x1b   :  { %p162_p12 = pnand %p161_p11, %p155_p8 }
  0x1c   :  { %49 = vadd.xlane.f32.xlu1 %v48_v11 }
  0xa3   :  { %v35_v12 = vpop.xlane.xlu0 %34 }
  0xa4   :  { %v39_v13 = vmul.f32 0.00390625, %v35_v12 }
  0xa5   :  { %v47_v14 = vpop.xlane.xlu1 %46 }
  0xa6   :  { %v51_v15 = vmul.f32 0.00390625, %v47_v14  ;;  %v53_v16 = vmul.f32 %v39_v13, %v39_v13  ;;  %v63_v34 = vsub.f32 %v29_v0, %v39_v13  ;;  %v64_v35 = vsub.f32 %v30_v1, %v39_v13 }
  0xa7   :  { %v38_v17 = vpop.xlane.xlu0 %37 }
  0xa8   :  { %v55_v18 = vsub.f32 %v51_v15, %v53_v16  ;;  %v40_v19 = vmul.f32 0.00390625, %v38_v17 }
  0xa9   :  { %v50_v20 = vpop.xlane.xlu1 %49 }
  0xaa   :  { %v57_v21 = vmax.f32 %v55_v18, 0.0  ;;  %v52_v22 = vmul.f32 0.00390625, %v50_v20  ;;  %v54_v23 = vmul.f32 %v40_v19, %v40_v19  ;;  %v65_v45 = vsub.f32 %v31_v2, %v40_v19 }
  0xab   :  { %v66_v46 = vsub.f32 %v32_v6, %v40_v19 }
  0xac   :  { %v59_v25 = vadd.f32 1e-12, %v57_v21  ;;  %v56_v26 = vsub.f32 %v52_v22, %v54_v23 }
  0xae   :  { %128 = vrsqrt.f32 %v59_v25  ;;  %v58_v27 = vmax.f32 %v56_v26, 0.0 }
  0xb0   :  { %v60_v29 = vadd.f32 1e-12, %v58_v27 }
  0xb2   :  { %130 = vrsqrt.f32 %v60_v29 }
  0xb8   :  { %v129_v38 = vpop.eup %128 }
  0xb9   :  { %v67_v39 = vmul.f32 %v129_v38, %v63_v34  ;;  %v68_v40 = vmul.f32 %v129_v38, %v64_v35 }
  0xbb   :  { %v84_v43 = vmul.f32 %v77_v36, %v67_v39  ;;  %v85_v44 = vmul.f32 %v81_v37, %v68_v40 }
  0xbc   :  { %v131_v47 = vpop.eup %130 }
  0xbd   :  { %v99_v48 = vadd.f32 %v92_v41, %v84_v43  ;;  %v100_v49 = vadd.f32 %v96_v42, %v85_v44  ;;  %v69_v50 = vmul.f32 %v131_v47, %v65_v45  ;;  %v70_v51 = vmul.f32 %v131_v47, %v66_v46 }
  0xbf   :  { %103 = vst [vmem:[#allocation5] sm:$0xff] %v99_v48  ;;  %104 = vst [vmem:[#allocation5 + $0x8] sm:$0xff] %v100_v49  ;;  %v86_v52 = vmul.f32 %v77_v36, %v69_v50  ;;  %v87_v53 = vmul.f32 %v81_v37, %v70_v51 }
  0xc1   :  { %v101_v54 = vadd.f32 %v92_v41, %v86_v52  ;;  %v102_v55 = vadd.f32 %v96_v42, %v87_v53 }
  0xc3   :  { %105 = vst [vmem:[#allocation5 + $0x10] sm:$0xff] %v101_v54  ;;  %106 = vst [vmem:[#allocation5 + $0x18] sm:$0xff] %v102_v55 }
  0xc4   :  { %165 = shalt.err (!%p162_p12)
}
  0xc5   :  { %s166_s5 = scalar_lea.hbm %s243_s3, 512 }
  0xc6   :  { %p167_p13 = scmp.ne.s32.totalorder %s243_s3, %s166_s5  ;;  %p170_p0 = scmp.lt.u32.totalorder %s166_s5, %s243_s3 }
  0xc8   :  { %p172_p1 = pnand %p170_p0, %p167_p13 }
  0xca   :  { %175 = shalt.err (!%p172_p1)
}
  0xcb   :  { %118 = dma.vmem_to_hbm [thread:$0]  %s113_s2, 512, %s243_s3, [#allocation4], %s181_s22, %s181_s22, %s182_s23  }
  0xcc   :  { %178 = dma.done.wait [#allocation4], 512  }
  0xcd   :  { %179 = vsyncadd [#allocation4], 4294966784 }
  0xce   :  { %122 = vsyncpa [#allocation3], 1 }
  0xcf   :  { %123 = vsyncpa [#allocation4], 1 }

</bundles_post_ra>
